<compile_context>
chip_gen: v6e
topology: v6e:2x2x1
jax: 0.10.0
libtpu: 0.0.40
codegen_flags: <defaults>
</compile_context>

<pallas_src>
import functools

import jax
import jax.numpy as jnp
from jax import lax
from jax.experimental import pallas as pl
from jax.experimental.pallas import tpu as pltpu

_LANE = 128      # lane width (last dim)
_SUBLANE = 8     # sublane count (second-to-last dim)


def _round_up(n, m):
    return ((n + m - 1) // m) * m


# ----------------------------------------------------------------------------
# Fused encoder+decoder kernel.
#   encoder: h_t = tanh(x_t @ Wx + h_{t-1} @ Wh + b)   -> final h
#   decoder: out = relu(h @ W1 + b1) @ W2 + b2
# Everything (tiny, padded) lives in VMEM; one kernel launch total.
# ----------------------------------------------------------------------------
def _fused_kernel(x_ref, wx_ref, wh_ref, b_enc_ref,
                  w1_ref, b1_ref, w2_ref, b2_ref, out_ref):
    seq_len, batch, in_dim = x_ref.shape
    hidden = wh_ref.shape[0]

    # ---- encoder --------------------------------------------------------
    # Hoist the sequence-independent input projection out of the recurrence:
    # one tall (S*B, D) x (D, H) matmul instead of S small ones on the serial
    # critical path.  Bias broadcast is also hoisted (added once, up front).
    x_all = x_ref[...].reshape(seq_len * batch, in_dim)
    xw = jnp.dot(x_all, wx_ref[...], preferred_element_type=jnp.float32)
    xwb = (xw + b_enc_ref[...]).reshape(seq_len, batch, hidden)

    wh = wh_ref[...]
    h = jnp.zeros((batch, hidden), jnp.float32)
    # seq_len is static and small: fully unroll so the scheduler can overlap
    # the tanh (EUP slot) of step t with the matmul push of step t+1.
    for t in range(seq_len):
        h = jnp.tanh(
            xwb[t] + jnp.dot(h, wh, preferred_element_type=jnp.float32)
        )

    # ---- decoder (2-layer MLP), fused in the same kernel ------------------
    z = jnp.dot(h, w1_ref[...], preferred_element_type=jnp.float32) + b1_ref[...]
    z = jnp.maximum(z, 0.0)
    out = jnp.dot(z, w2_ref[...], preferred_element_type=jnp.float32) + b2_ref[...]
    out_ref[...] = out.astype(out_ref.dtype)  # lane-dense (padded) store


def _pad2(a, rows, cols):
    return jnp.pad(a, ((0, rows - a.shape[0]), (0, cols - a.shape[1])))


# ----------------------------------------------------------------------------
# ReceptiveFieldNN.forward equivalent: single jit, single pallas_call.
# ----------------------------------------------------------------------------
@jax.jit
def receptive_field_nn_forward(x, params):
    batch_size = x.shape[1]          # mirrors `batch_size = x.shape[1]`
    seq_len, _, in_dim = x.shape
    hidden = params["wh"].shape[0]
    out_dim = params["w2"].shape[1]

    # Pad to TPU-friendly tiles: batch -> multiple of 8 (sublane),
    # feature dims -> multiple of 128 (lane).  Exact (zero) padding.
    bp = _round_up(batch_size, _SUBLANE)
    dp = _round_up(in_dim, _LANE)
    hp = _round_up(hidden, _LANE)
    op = _round_up(out_dim, _LANE)

    x_p = jnp.pad(x, ((0, 0), (0, bp - batch_size), (0, dp - in_dim)))
    wx_p = _pad2(params["wx"], dp, hp)
    wh_p = _pad2(params["wh"], hp, hp)
    b_enc_p = _pad2(params["b_enc"], 1, hp)
    w1_p = _pad2(params["w1"], hp, hp)
    b1_p = _pad2(params["b1"], 1, hp)
    w2_p = _pad2(params["w2"], hp, op)
    b2_p = _pad2(params["b2"], 1, op)

    vmem = functools.partial(pl.BlockSpec, memory_space=pltpu.MemorySpace.VMEM)
    out_p = pl.pallas_call(
        _fused_kernel,
        out_shape=jax.ShapeDtypeStruct((bp, op), jnp.float32),
        in_specs=[vmem() for _ in range(8)],
        out_specs=vmem(),
    )(x_p, wx_p, wh_p, b_enc_p, w1_p, b1_p, w2_p, b2_p)

    # Slice away padding (encoder squeeze(0) is implicit in the fused kernel).
    return out_p[:batch_size, :out_dim]


# Pure-JAX reference for a sanity check.
def _reference_forward(x, params):
    def step(h, x_t):
        h = jnp.tanh(x_t @ params["wx"] + h @ params["wh"] + params["b_enc"])
        return h, None

    h0 = jnp.zeros((x.shape[1], params["wh"].shape[0]), jnp.float32)
    h, _ = lax.scan(step, h0, x)
    z = jnp.maximum(h @ params["w1"] + params["b1"], 0.0)
    return z @ params["w2"] + params["b2"]


if __name__ == "__main__":
    seq_len, batch, input_dim, hidden, out_dim = 8, 2, 4, 32, 4

    key = jax.random.PRNGKey(0)
    k_x, k_wx, k_wh, k_w1, k_w2, k_b = jax.random.split(key, 6)

    x = jax.random.normal(k_x, (seq_len, batch, input_dim), jnp.float32)

    params = {
        "wx": jax.random.normal(k_wx, (input_dim, hidden), jnp.float32) * 0.1,
        "wh": jax.random.normal(k_wh, (hidden, hidden), jnp.float32) * 0.1,
        "b_enc": jax.random.normal(k_b, (1, hidden), jnp.float32) * 0.01,
        "w1": jax.random.normal(k_w1, (hidden, hidden), jnp.float32) * 0.1,
        "b1": jnp.zeros((1, hidden), jnp.float32),
        "w2": jax.random.normal(k_w2, (hidden, out_dim), jnp.float32) * 0.1,
        "b2": jnp.zeros((1, out_dim), jnp.float32),
    }

    out = receptive_field_nn_forward(x, params)
    out = jax.block_until_ready(out)

    ref = _reference_forward(x, params)
    assert out.shape == (batch, out_dim), out.shape
    assert jnp.allclose(out, ref, atol=1e-4, rtol=1e-4), "mismatch vs reference"

    print("KERNEL_OK")
</pallas_src>

<mosaic_0001>
module attributes {stable_mosaic.version = 11 : i64} {
  func.func @_fused_kernel(%arg0: memref<8x8x128xf32, #tpu.memory_space<vmem>>, %arg1: memref<128x128xf32, #tpu.memory_space<vmem>>, %arg2: memref<128x128xf32, #tpu.memory_space<vmem>>, %arg3: memref<1x128xf32, #tpu.memory_space<vmem>>, %arg4: memref<128x128xf32, #tpu.memory_space<vmem>>, %arg5: memref<1x128xf32, #tpu.memory_space<vmem>>, %arg6: memref<128x128xf32, #tpu.memory_space<vmem>>, %arg7: memref<1x128xf32, #tpu.memory_space<vmem>>, %arg8: memref<8x128xf32, #tpu.memory_space<vmem>>) attributes {dimension_semantics = [], scalar_prefetch = 0 : i64, scratch_operands = 0 : i64, tpu.core_type = #tpu.core_type<tc>} {
    %c0 = arith.constant 0 : index
    %c0_0 = arith.constant 0 : index
    %c0_1 = arith.constant 0 : index
    %0 = vector.load %arg0[%c0, %c0_0, %c0_1] : memref<8x8x128xf32, #tpu.memory_space<vmem>>, vector<8x8x128xf32>
    %1 = vector.shape_cast %0 : vector<8x8x128xf32> to vector<64x128xf32>
    %c0_2 = arith.constant 0 : index
    %c0_3 = arith.constant 0 : index
    %2 = vector.load %arg1[%c0_2, %c0_3] : memref<128x128xf32, #tpu.memory_space<vmem>>, vector<128x128xf32>
    %cst = arith.constant dense<0.000000e+00> : vector<64x128xf32>
    %3 = tpu.matmul %1, %2, %cst {dimension_numbers = #tpu.dot_dimension_numbers<[1], [0], [0], [1], [0, 0, 1, 1], [], []>} : vector<64x128xf32>, vector<128x128xf32>, vector<64x128xf32> -> vector<64x128xf32>
    %c0_4 = arith.constant 0 : index
    %c0_5 = arith.constant 0 : index
    %4 = vector.load %arg3[%c0_4, %c0_5] : memref<1x128xf32, #tpu.memory_space<vmem>>, vector<1x128xf32>
    %5 = vector.broadcast %4 : vector<1x128xf32> to vector<64x128xf32>
    %6 = arith.addf %3, %5 : vector<64x128xf32>
    %7 = vector.shape_cast %6 : vector<64x128xf32> to vector<8x8x128xf32>
    %c0_6 = arith.constant 0 : index
    %c0_7 = arith.constant 0 : index
    %8 = vector.load %arg2[%c0_6, %c0_7] : memref<128x128xf32, #tpu.memory_space<vmem>>, vector<128x128xf32>
    %cst_8 = arith.constant 0.000000e+00 : f32
    %9 = vector.broadcast %cst_8 : f32 to vector<8x128xf32>
    %10 = vector.extract_strided_slice %7 {offsets = [0, 0, 0], sizes = [1, 8, 128], strides = [1, 1, 1]} : vector<8x8x128xf32> to vector<1x8x128xf32>
    %11 = vector.shape_cast %10 : vector<1x8x128xf32> to vector<8x128xf32>
    %cst_9 = arith.constant dense<0.000000e+00> : vector<8x128xf32>
    %12 = tpu.matmul %9, %8, %cst_9 {dimension_numbers = #tpu.dot_dimension_numbers<[1], [0], [0], [1], [0, 0, 1, 1], [], []>} : vector<8x128xf32>, vector<128x128xf32>, vector<8x128xf32> -> vector<8x128xf32>
    %13 = arith.addf %11, %12 : vector<8x128xf32>
    %14 = math.tanh %13 : vector<8x128xf32>
    %15 = vector.extract_strided_slice %7 {offsets = [1, 0, 0], sizes = [1, 8, 128], strides = [1, 1, 1]} : vector<8x8x128xf32> to vector<1x8x128xf32>
    %16 = vector.shape_cast %15 : vector<1x8x128xf32> to vector<8x128xf32>
    %cst_10 = arith.constant dense<0.000000e+00> : vector<8x128xf32>
    %17 = tpu.matmul %14, %8, %cst_10 {dimension_numbers = #tpu.dot_dimension_numbers<[1], [0], [0], [1], [0, 0, 1, 1], [], []>} : vector<8x128xf32>, vector<128x128xf32>, vector<8x128xf32> -> vector<8x128xf32>
    %18 = arith.addf %16, %17 : vector<8x128xf32>
    %19 = math.tanh %18 : vector<8x128xf32>
    %20 = vector.extract_strided_slice %7 {offsets = [2, 0, 0], sizes = [1, 8, 128], strides = [1, 1, 1]} : vector<8x8x128xf32> to vector<1x8x128xf32>
    %21 = vector.shape_cast %20 : vector<1x8x128xf32> to vector<8x128xf32>
    %cst_11 = arith.constant dense<0.000000e+00> : vector<8x128xf32>
    %22 = tpu.matmul %19, %8, %cst_11 {dimension_numbers = #tpu.dot_dimension_numbers<[1], [0], [0], [1], [0, 0, 1, 1], [], []>} : vector<8x128xf32>, vector<128x128xf32>, vector<8x128xf32> -> vector<8x128xf32>
    %23 = arith.addf %21, %22 : vector<8x128xf32>
    %24 = math.tanh %23 : vector<8x128xf32>
    %25 = vector.extract_strided_slice %7 {offsets = [3, 0, 0], sizes = [1, 8, 128], strides = [1, 1, 1]} : vector<8x8x128xf32> to vector<1x8x128xf32>
    %26 = vector.shape_cast %25 : vector<1x8x128xf32> to vector<8x128xf32>
    %cst_12 = arith.constant dense<0.000000e+00> : vector<8x128xf32>
    %27 = tpu.matmul %24, %8, %cst_12 {dimension_numbers = #tpu.dot_dimension_numbers<[1], [0], [0], [1], [0, 0, 1, 1], [], []>} : vector<8x128xf32>, vector<128x128xf32>, vector<8x128xf32> -> vector<8x128xf32>
    %28 = arith.addf %26, %27 : vector<8x128xf32>
    %29 = math.tanh %28 : vector<8x128xf32>
    %30 = vector.extract_strided_slice %7 {offsets = [4, 0, 0], sizes = [1, 8, 128], strides = [1, 1, 1]} : vector<8x8x128xf32> to vector<1x8x128xf32>
    %31 = vector.shape_cast %30 : vector<1x8x128xf32> to vector<8x128xf32>
    %cst_13 = arith.constant dense<0.000000e+00> : vector<8x128xf32>
    %32 = tpu.matmul %29, %8, %cst_13 {dimension_numbers = #tpu.dot_dimension_numbers<[1], [0], [0], [1], [0, 0, 1, 1], [], []>} : vector<8x128xf32>, vector<128x128xf32>, vector<8x128xf32> -> vector<8x128xf32>
    %33 = arith.addf %31, %32 : vector<8x128xf32>
    %34 = math.tanh %33 : vector<8x128xf32>
    %35 = vector.extract_strided_slice %7 {offsets = [5, 0, 0], sizes = [1, 8, 128], strides = [1, 1, 1]} : vector<8x8x128xf32> to vector<1x8x128xf32>
    %36 = vector.shape_cast %35 : vector<1x8x128xf32> to vector<8x128xf32>
    %cst_14 = arith.constant dense<0.000000e+00> : vector<8x128xf32>
    %37 = tpu.matmul %34, %8, %cst_14 {dimension_numbers = #tpu.dot_dimension_numbers<[1], [0], [0], [1], [0, 0, 1, 1], [], []>} : vector<8x128xf32>, vector<128x128xf32>, vector<8x128xf32> -> vector<8x128xf32>
    %38 = arith.addf %36, %37 : vector<8x128xf32>
    %39 = math.tanh %38 : vector<8x128xf32>
    %40 = vector.extract_strided_slice %7 {offsets = [6, 0, 0], sizes = [1, 8, 128], strides = [1, 1, 1]} : vector<8x8x128xf32> to vector<1x8x128xf32>
    %41 = vector.shape_cast %40 : vector<1x8x128xf32> to vector<8x128xf32>
    %cst_15 = arith.constant dense<0.000000e+00> : vector<8x128xf32>
    %42 = tpu.matmul %39, %8, %cst_15 {dimension_numbers = #tpu.dot_dimension_numbers<[1], [0], [0], [1], [0, 0, 1, 1], [], []>} : vector<8x128xf32>, vector<128x128xf32>, vector<8x128xf32> -> vector<8x128xf32>
    %43 = arith.addf %41, %42 : vector<8x128xf32>
    %44 = math.tanh %43 : vector<8x128xf32>
    %45 = vector.extract_strided_slice %7 {offsets = [7, 0, 0], sizes = [1, 8, 128], strides = [1, 1, 1]} : vector<8x8x128xf32> to vector<1x8x128xf32>
    %46 = vector.shape_cast %45 : vector<1x8x128xf32> to vector<8x128xf32>
    %cst_16 = arith.constant dense<0.000000e+00> : vector<8x128xf32>
    %47 = tpu.matmul %44, %8, %cst_16 {dimension_numbers = #tpu.dot_dimension_numbers<[1], [0], [0], [1], [0, 0, 1, 1], [], []>} : vector<8x128xf32>, vector<128x128xf32>, vector<8x128xf32> -> vector<8x128xf32>
    %48 = arith.addf %46, %47 : vector<8x128xf32>
    %49 = math.tanh %48 : vector<8x128xf32>
    %c0_17 = arith.constant 0 : index
    %c0_18 = arith.constant 0 : index
    %50 = vector.load %arg4[%c0_17, %c0_18] : memref<128x128xf32, #tpu.memory_space<vmem>>, vector<128x128xf32>
    %cst_19 = arith.constant dense<0.000000e+00> : vector<8x128xf32>
    %51 = tpu.matmul %49, %50, %cst_19 {dimension_numbers = #tpu.dot_dimension_numbers<[1], [0], [0], [1], [0, 0, 1, 1], [], []>} : vector<8x128xf32>, vector<128x128xf32>, vector<8x128xf32> -> vector<8x128xf32>
    %c0_20 = arith.constant 0 : index
    %c0_21 = arith.constant 0 : index
    %52 = vector.load %arg5[%c0_20, %c0_21] : memref<1x128xf32, #tpu.memory_space<vmem>>, vector<1x128xf32>
    %53 = vector.broadcast %52 : vector<1x128xf32> to vector<8x128xf32>
    %54 = arith.addf %51, %53 : vector<8x128xf32>
    %cst_22 = arith.constant 0.000000e+00 : f32
    %55 = vector.broadcast %cst_22 : f32 to vector<8x128xf32>
    %56 = arith.maximumf %54, %55 : vector<8x128xf32>
    %c0_23 = arith.constant 0 : index
    %c0_24 = arith.constant 0 : index
    %57 = vector.load %arg6[%c0_23, %c0_24] : memref<128x128xf32, #tpu.memory_space<vmem>>, vector<128x128xf32>
    %cst_25 = arith.constant dense<0.000000e+00> : vector<8x128xf32>
    %58 = tpu.matmul %56, %57, %cst_25 {dimension_numbers = #tpu.dot_dimension_numbers<[1], [0], [0], [1], [0, 0, 1, 1], [], []>} : vector<8x128xf32>, vector<128x128xf32>, vector<8x128xf32> -> vector<8x128xf32>
    %c0_26 = arith.constant 0 : index
    %c0_27 = arith.constant 0 : index
    %59 = vector.load %arg7[%c0_26, %c0_27] : memref<1x128xf32, #tpu.memory_space<vmem>>, vector<1x128xf32>
    %60 = vector.broadcast %59 : vector<1x128xf32> to vector<8x128xf32>
    %61 = arith.addf %58, %60 : vector<8x128xf32>
    %c0_28 = arith.constant 0 : index
    %c0_29 = arith.constant 0 : index
    %62 = vector.load %arg8[%c0_28, %c0_29] : memref<8x128xf32, #tpu.memory_space<vmem>>, vector<8x128xf32>
    tpu.vector_store %arg8[%c0_28, %c0_29], %61 {strides = array<i32>} : memref<8x128xf32, #tpu.memory_space<vmem>>, vector<8x128xf32>,
    return
  }
}

</mosaic_0001>

<bundles_post_ra>
// kernel: receptive_field_nn_forward.1
= control target key start
LH: loop header
LB: loop body
LE: loop exit
PB: predicated region body
PF: predicated region fallthrough
CT: control target
= control target key end

     0   :  { %v1558_v2 = vmov 0.0   ;;  %vm1559_vm0 = vmmov 0   ;;  %s2199_s1 = inlined_call_operand.vmem [shape: f32[128,128], index: 1, kind: input, shape index: {}]   ;;  %s2200_s2 = inlined_call_operand.vmem [shape: f32[128,128], index: 2, kind: input, shape index: {}]   ;;  %s2201_s0 = inlined_call_operand.vmem [shape: f32[8,8,128], index: 0, kind: input, shape index: {}]   ;;  %s2202_s3 = inlined_call_operand.vmem [shape: f32[1,128], index: 3, kind: input, shape index: {}]   ;;  %s2203_s4 = inlined_call_operand.vmem [shape: f32[128,128], index: 4, kind: input, shape index: {}]   ;;  %s2204_s6 = inlined_call_operand.vmem [shape: f32[128,128], index: 6, kind: input, shape index: {}]   ;;  %s2205_s5 = inlined_call_operand.vmem [shape: f32[1,128], index: 5, kind: input, shape index: {}]   ;;  %s2206_s7 = inlined_call_operand.vmem [shape: f32[1,128], index: 7, kind: input, shape index: {}]   ;;  %s2207_s8 = inlined_call_operand.vmem [shape: f32[8,128], index: 8, kind: output, shape index: {}]  }
   0x1   :  { %v52_v0 = vld [vmem:[%s2199_s1 + $0x78] sm:$0xff]  ;;  %v51_v1 = vld [vmem:[%s2199_s1 + $0x70] sm:$0xff]  ;;  %1190 = vmatprep.subr.mxu1 %v1558_v2  ;;  %1222 = vmatprep.mubr.msk.f32.mxu1 %vm1559_vm0, %v1558_v2  ;;  %v50_v5 = vld [vmem:[%s2199_s1 + $0x68] sm:$0xff] }
   0x2   :  { %v1615_v3 = vld [vmem:[%s2200_s2 + $0x78] sm:$0xff]  ;;  %1146 = vmatprep.subr.mxu0 %v52_v0  ;;  %v1623_v4 = vld [vmem:[%s2200_s2 + $0x70] sm:$0xff]  ;;  %v1632_v6 = vld [vmem:[%s2200_s2 + $0x68] sm:$0xff] }
   0x3   :  { %1191 = vmatpush3.msra.mxu1 %v1615_v3  ;;  %1147 = vmatpush3.msra.mxu0 %v52_v0  ;;  %v49_v7 = vld [vmem:[%s2199_s1 + $0x60] sm:$0xff]  ;;  %v48_v9 = vld [vmem:[%s2199_s1 + $0x58] sm:$0xff]  ;;  %v47_v11 = vld [vmem:[%s2199_s1 + $0x50] sm:$0xff] }
   0x4   :  { %1192 = vmatprep.subr.mxu1 %v1558_v2  ;;  %1148 = vmatprep.subr.mxu0 %v51_v1  ;;  %v1642_v8 = vld [vmem:[%s2200_s2 + $0x60] sm:$0xff]  ;;  %v1652_v10 = vld [vmem:[%s2200_s2 + $0x58] sm:$0xff]  ;;  %v1662_v12 = vld [vmem:[%s2200_s2 + $0x50] sm:$0xff] }
   0x5   :  { %1193 = vmatpush3.msra.mxu1 %v1623_v4  ;;  %1149 = vmatpush3.msra.mxu0 %v51_v1  ;;  %v46_v13 = vld [vmem:[%s2199_s1 + $0x48] sm:$0xff]  ;;  %v45_v15 = vld [vmem:[%s2199_s1 + $0x40] sm:$0xff]  ;;  %v44_v17 = vld [vmem:[%s2199_s1 + $0x38] sm:$0xff] }
   0x6   :  { %1194 = vmatprep.subr.mxu1 %v1558_v2  ;;  %1150 = vmatprep.subr.mxu0 %v50_v5  ;;  %v1672_v14 = vld [vmem:[%s2200_s2 + $0x48] sm:$0xff]  ;;  %v1682_v16 = vld [vmem:[%s2200_s2 + $0x40] sm:$0xff]  ;;  %v1692_v18 = vld [vmem:[%s2200_s2 + $0x38] sm:$0xff] }
   0x7   :  { %1195 = vmatpush3.msra.mxu1 %v1632_v6  ;;  %1151 = vmatpush3.msra.mxu0 %v50_v5  ;;  %v43_v19 = vld [vmem:[%s2199_s1 + $0x30] sm:$0xff]  ;;  %v42_v21 = vld [vmem:[%s2199_s1 + $0x28] sm:$0xff]  ;;  %v41_v23 = vld [vmem:[%s2199_s1 + $0x20] sm:$0xff] }
   0x8   :  { %1196 = vmatprep.subr.mxu1 %v1558_v2  ;;  %1152 = vmatprep.subr.mxu0 %v49_v7  ;;  %v1702_v20 = vld [vmem:[%s2200_s2 + $0x30] sm:$0xff]  ;;  %v1712_v22 = vld [vmem:[%s2200_s2 + $0x28] sm:$0xff]  ;;  %v1722_v24 = vld [vmem:[%s2200_s2 + $0x20] sm:$0xff] }
   0x9   :  { %1197 = vmatpush3.msra.mxu1 %v1642_v8  ;;  %1153 = vmatpush3.msra.mxu0 %v49_v7  ;;  %v40_v25 = vld [vmem:[%s2199_s1 + $0x18] sm:$0xff]  ;;  %v39_v27 = vld [vmem:[%s2199_s1 + $0x10] sm:$0xff]  ;;  %v38_v29 = vld [vmem:[%s2199_s1 + $0x8] sm:$0xff] }
   0xa   :  { %1198 = vmatprep.subr.mxu1 %v1558_v2  ;;  %1154 = vmatprep.subr.mxu0 %v48_v9  ;;  %v1732_v26 = vld [vmem:[%s2200_s2 + $0x18] sm:$0xff]  ;;  %v1742_v28 = vld [vmem:[%s2200_s2 + $0x10] sm:$0xff]  ;;  %v29_v30 = vld [vmem:[%s2201_s0] sm:$0xff] }
   0xb   :  { %1199 = vmatpush3.msra.mxu1 %v1652_v10  ;;  %1155 = vmatpush3.msra.mxu0 %v48_v9  ;;  %v1756_v31 = vld [vmem:[%s2200_s2 + $0x8] sm:$0xff]  ;;  %v37_v32 = vld [vmem:[%s2199_s1] sm:$0xff]  ;;  %v31_v35 = vld [vmem:[%s2201_s0 + $0x10] sm:$0xff] }
   0xc   :  { %1200 = vmatprep.subr.mxu1 %v1558_v2  ;;  %1156 = vmatprep.subr.mxu0 %v47_v11  ;;  %v1765_v33 = vld [vmem:[%s2200_s2] sm:$0xff]  ;;  %v30_v34 = vld [vmem:[%s2201_s0 + $0x8] sm:$0xff]  ;;  %v32_v36 = vld [vmem:[%s2201_s0 + $0x18] sm:$0xff] }
   0xd   :  { %1201 = vmatpush3.msra.mxu1 %v1662_v12  ;;  %1157 = vmatpush3.msra.mxu0 %v47_v11  ;;  %v33_v37 = vld [vmem:[%s2201_s0 + $0x20] sm:$0xff]  ;;  %v34_v38 = vld [vmem:[%s2201_s0 + $0x28] sm:$0xff]  ;;  %v35_v39 = vld [vmem:[%s2201_s0 + $0x30] sm:$0xff] }
   0xe   :  { %1202 = vmatprep.subr.mxu1 %v1558_v2  ;;  %1158 = vmatprep.subr.mxu0 %v46_v13  ;;  %v36_v40 = vld [vmem:[%s2201_s0 + $0x38] sm:$0xff]  ;;  %v1865_v43 = vld [vmem:[%s2202_s3] ss:$0 sm:$0xff] }
   0xf   :  { %1203 = vmatpush3.msra.mxu1 %v1672_v14  ;;  %1159 = vmatpush3.msra.mxu0 %v46_v13 }
  0x10   :  { %1204 = vmatprep.subr.mxu1 %v1558_v2  ;;  %1160 = vmatprep.subr.mxu0 %v45_v15 }
  0x11   :  { %1205 = vmatpush3.msra.mxu1 %v1682_v16  ;;  %1161 = vmatpush3.msra.mxu0 %v45_v15 }
  0x12   :  { %1206 = vmatprep.subr.mxu1 %v1558_v2  ;;  %1162 = vmatprep.subr.mxu0 %v44_v17 }
  0x13   :  { %1207 = vmatpush3.msra.mxu1 %v1692_v18  ;;  %1163 = vmatpush3.msra.mxu0 %v44_v17 }
  0x14   :  { %1208 = vmatprep.subr.mxu1 %v1558_v2  ;;  %1164 = vmatprep.subr.mxu0 %v43_v19 }
  0x15   :  { %1209 = vmatpush3.msra.mxu1 %v1702_v20  ;;  %1165 = vmatpush3.msra.mxu0 %v43_v19 }
  0x16   :  { %1210 = vmatprep.subr.mxu1 %v1558_v2  ;;  %1166 = vmatprep.subr.mxu0 %v42_v21 }
  0x17   :  { %1211 = vmatpush3.msra.mxu1 %v1712_v22  ;;  %1167 = vmatpush3.msra.mxu0 %v42_v21 }
  0x18   :  { %1212 = vmatprep.subr.mxu1 %v1558_v2  ;;  %1168 = vmatprep.subr.mxu0 %v41_v23 }
  0x19   :  { %1213 = vmatpush3.msra.mxu1 %v1722_v24  ;;  %1169 = vmatpush3.msra.mxu0 %v41_v23  ;;  %v766_v23 = vld [vmem:[%s2203_s4 + $0x48] sm:$0xff] }
  0x1a   :  { %1214 = vmatprep.subr.mxu1 %v1558_v2  ;;  %1170 = vmatprep.subr.mxu0 %v40_v25 }
  0x1b   :  { %1215 = vmatpush3.msra.mxu1 %v1732_v26  ;;  %1171 = vmatpush3.msra.mxu0 %v40_v25 }
  0x1c   :  { %1216 = vmatprep.subr.mxu1 %v1558_v2  ;;  %1172 = vmatprep.subr.mxu0 %v39_v27 }
  0x1d   :  { %1217 = vmatpush3.msra.mxu1 %v1742_v28  ;;  %1173 = vmatpush3.msra.mxu0 %v39_v27 }
  0x1e   :  { %1218 = vmatprep.subr.mxu1 %v1558_v2  ;;  %1174 = vmatprep.subr.mxu0 %v38_v29 }
  0x1f   :  { %1178 = vmatprep.mubr.f32.mxu0 %v29_v30  ;;  %1175 = vmatpush3.msra.mxu0 %v38_v29  ;;  %v765_v29 = vld [vmem:[%s2203_s4 + $0x40] sm:$0xff]  ;;  %v764_v30 = vld [vmem:[%s2203_s4 + $0x38] sm:$0xff] }
  0x20   :  { %1219 = vmatpush3.msra.mxu1 %v1756_v31  ;;  %1176 = vmatprep.subr.mxu0 %v37_v32 }
  0x21   :  { %1220 = vmatprep.subr.mxu1 %v1558_v2  ;;  %1177 = vmatpush3.msra.mxu0 %v37_v32  ;;  %v762_v32 = vld [vmem:[%s2203_s4 + $0x28] sm:$0xff] }
  0x22   :  { %1221 = vmatpush3.msra.mxu1 %v1765_v33  ;;  %1179 = vmatmul.mubr.f32.vlgmr.msra.gmra.mxu0 %v30_v34  ;;  %v760_v34 = vld [vmem:[%s2203_s4 + $0x18] sm:$0xff] }
  0x23   :  { %1223 = vmatmul.mubr.f32.vlgmr.msra.gmra.mxu1 %v1558_v2  ;;  %1225 = vmatprep.subr.mxu0 %v1558_v2 }
  0x24   :  { %1260 = vmatprep.subr.mxu1 %v1558_v2  ;;  %1226 = vmatpush3.msra.mxu0 %v1615_v3 }
  0x25   :  { %1261 = vmatpush3.msra.mxu1 %v1615_v3  ;;  %1227 = vmatprep.subr.mxu0 %v1558_v2 }
  0x26   :  { %1262 = vmatprep.subr.mxu1 %v1558_v2  ;;  %1228 = vmatpush3.msra.mxu0 %v1623_v4 }
  0x27   :  { %1263 = vmatpush3.msra.mxu1 %v1623_v4  ;;  %1229 = vmatprep.subr.mxu0 %v1558_v2 }
  0x28   :  { %1264 = vmatprep.subr.mxu1 %v1558_v2  ;;  %1230 = vmatpush3.msra.mxu0 %v1632_v6 }
  0x29   :  { %1265 = vmatpush3.msra.mxu1 %v1632_v6  ;;  %1231 = vmatprep.subr.mxu0 %v1558_v2 }
  0x2a   :  { %1266 = vmatprep.subr.mxu1 %v1558_v2  ;;  %1232 = vmatpush3.msra.mxu0 %v1642_v8 }
  0x2b   :  { %1267 = vmatpush3.msra.mxu1 %v1642_v8  ;;  %1233 = vmatprep.subr.mxu0 %v1558_v2 }
  0x2c   :  { %1268 = vmatprep.subr.mxu1 %v1558_v2  ;;  %1234 = vmatpush3.msra.mxu0 %v1652_v10 }
  0x2d   :  { %1269 = vmatpush3.msra.mxu1 %v1652_v10  ;;  %1235 = vmatprep.subr.mxu0 %v1558_v2 }
  0x2e   :  { %1270 = vmatprep.subr.mxu1 %v1558_v2  ;;  %1236 = vmatpush3.msra.mxu0 %v1662_v12 }
  0x2f   :  { %1271 = vmatpush3.msra.mxu1 %v1662_v12  ;;  %1237 = vmatprep.subr.mxu0 %v1558_v2 }
  0x30   :  { %1272 = vmatprep.subr.mxu1 %v1558_v2  ;;  %1238 = vmatpush3.msra.mxu0 %v1672_v14 }
  0x31   :  { %1273 = vmatpush3.msra.mxu1 %v1672_v14  ;;  %1239 = vmatprep.subr.mxu0 %v1558_v2 }
  0x32   :  { %1274 = vmatprep.subr.mxu1 %v1558_v2  ;;  %1240 = vmatpush3.msra.mxu0 %v1682_v16 }
  0x33   :  { %1275 = vmatpush3.msra.mxu1 %v1682_v16  ;;  %1241 = vmatprep.subr.mxu0 %v1558_v2 }
  0x34   :  { %1276 = vmatprep.subr.mxu1 %v1558_v2  ;;  %1242 = vmatpush3.msra.mxu0 %v1692_v18 }
  0x35   :  { %1277 = vmatpush3.msra.mxu1 %v1692_v18  ;;  %1243 = vmatprep.subr.mxu0 %v1558_v2 }
  0x36   :  { %1278 = vmatprep.subr.mxu1 %v1558_v2  ;;  %1244 = vmatpush3.msra.mxu0 %v1702_v20 }
  0x37   :  { %1279 = vmatpush3.msra.mxu1 %v1702_v20  ;;  %1245 = vmatprep.subr.mxu0 %v1558_v2 }
  0x38   :  { %1280 = vmatprep.subr.mxu1 %v1558_v2  ;;  %1246 = vmatpush3.msra.mxu0 %v1712_v22 }
  0x39   :  { %1281 = vmatpush3.msra.mxu1 %v1712_v22  ;;  %1247 = vmatprep.subr.mxu0 %v1558_v2 }
  0x3a   :  { %1282 = vmatprep.subr.mxu1 %v1558_v2  ;;  %1248 = vmatpush3.msra.mxu0 %v1722_v24 }
  0x3b   :  { %1283 = vmatpush3.msra.mxu1 %v1722_v24  ;;  %1249 = vmatprep.subr.mxu0 %v1558_v2 }
  0x3c   :  { %1284 = vmatprep.subr.mxu1 %v1558_v2  ;;  %1250 = vmatpush3.msra.mxu0 %v1732_v26 }
  0x3d   :  { %1285 = vmatpush3.msra.mxu1 %v1732_v26  ;;  %1251 = vmatprep.subr.mxu0 %v1558_v2 }
  0x3e   :  { %1286 = vmatprep.subr.mxu1 %v1558_v2  ;;  %1252 = vmatpush3.msra.mxu0 %v1742_v28 }
  0x3f   :  { %1287 = vmatpush3.msra.mxu1 %v1742_v28  ;;  %1253 = vmatprep.subr.mxu0 %v1558_v2 }
  0x40   :  { %1288 = vmatprep.subr.mxu1 %v1558_v2  ;;  %1254 = vmatpush3.msra.mxu0 %v1756_v31 }
  0x41   :  { %1289 = vmatpush3.msra.mxu1 %v1756_v31  ;;  %1255 = vmatprep.subr.mxu0 %v1558_v2 }
  0x42   :  { %1290 = vmatprep.subr.mxu1 %v1558_v2  ;;  %1256 = vmatpush3.msra.mxu0 %v1765_v33 }
  0x43   :  { %1291 = vmatpush3.msra.mxu1 %v1765_v33  ;;  %1292 = vmatprep.mubr.msk.f32.mxu1 %vm1559_vm0, %v1558_v2 }
  0x44   :  { %1295 = vmatprep.subr.mxu0 %v1558_v2  ;;  %1330 = vmatprep.subr.mxu1 %v1558_v2 }
  0x45   :  { %1181 = vmatprep.mubr.f32.mxu0 %v31_v35  ;;  %v759_v35 = vld [vmem:[%s2203_s4 + $0x10] sm:$0xff] }
  0x46   :  { %1182 = vmatmul.mubr.f32.gmra.mxu0 %v32_v36  ;;  %v758_v36 = vld [vmem:[%s2203_s4 + $0x8] sm:$0xff] }
  0x47   :  { %1184 = vmatprep.mubr.f32.mxu0 %v33_v37  ;;  %v757_v37 = vld [vmem:[%s2203_s4] sm:$0xff] }
  0x4a   :  { %1185 = vmatmul.mubr.f32.gmra.mxu0 %v34_v38  ;;  %v866_v38 = vld [vmem:[%s2204_s6 + $0x78] sm:$0xff] }
  0x4b   :  { %1187 = vmatprep.mubr.f32.mxu0 %v35_v39  ;;  %v865_v39 = vld [vmem:[%s2204_s6 + $0x70] sm:$0xff] }
  0x4e   :  { %1188 = vmatmul.mubr.f32.gmra.mxu0 %v36_v40  ;;  %v864_v40 = vld [vmem:[%s2204_s6 + $0x68] sm:$0xff] }
  0x4f   :  { %1257 = vmatprep.mubr.msk.f32.mxu0 %vm1559_vm0, %v1558_v2 }
  0xe2   :  { %v1180_v41 = vpop.f32.mrf.mxu0 }
  0xe3   :  { %v247_v42 = vpop.f32.mrf.mxu1  ;;  %v132_v55 = vadd.f32 %v1180_v41, %v1865_v43  ;;  %v863_v41 = vld [vmem:[%s2204_s6 + $0x60] sm:$0xff] }
  0xe4   :  { %v126_v44 = vpop.f32.mrf.mxu0 }
  0xe5   :  { %v1224_v45 = vpop.f32.mrf.mxu1  ;;  %v127_v46 = vadd.f32 %v1865_v43, %v126_v44  ;;  %v861_v44 = vld [vmem:[%s2204_s6 + $0x50] sm:$0xff] }
  0xe6   :  { %v860_v45 = vld [vmem:[%s2204_s6 + $0x48] sm:$0xff] }
  0xe7   :  { %v251_v47 = vadd.f32 %v247_v42, %v127_v46  ;;  %v862_v42 = vld [vmem:[%s2204_s6 + $0x58] sm:$0xff]  ;;  %v859_v46 = vld [vmem:[%s2204_s6 + $0x40] sm:$0xff] }
  0xe9   :  { %1542 = vtanh.f32 %v251_v47  ;;  %v858_v47 = vld [vmem:[%s2204_s6 + $0x38] sm:$0xff] }
  0xf6   :  { %v1543_v48 = vpop.eup %1542 }
  0xf7   :  { %1258 = vmatmul.mubr.f32.vlgmr.msra.gmra.mxu0 %v1543_v48  ;;  %v857_v48 = vld [vmem:[%s2204_s6 + $0x30] sm:$0xff] }
  0xf8   :  { %1296 = vmatpush3.msra.mxu0 %v1615_v3  ;;  %1327 = vmatprep.mubr.msk.f32.mxu0 %vm1559_vm0, %v1558_v2 }
  0xf9   :  { %1297 = vmatprep.subr.mxu0 %v1558_v2 }
  0xfa   :  { %1298 = vmatpush3.msra.mxu0 %v1623_v4 }
  0xfb   :  { %1299 = vmatprep.subr.mxu0 %v1558_v2 }
  0xfc   :  { %1300 = vmatpush3.msra.mxu0 %v1632_v6 }
  0xfd   :  { %1301 = vmatprep.subr.mxu0 %v1558_v2 }
  0xfe   :  { %1302 = vmatpush3.msra.mxu0 %v1642_v8 }
  0xff   :  { %1303 = vmatprep.subr.mxu0 %v1558_v2 }
 0x100   :  { %1304 = vmatpush3.msra.mxu0 %v1652_v10 }
 0x101   :  { %1305 = vmatprep.subr.mxu0 %v1558_v2 }
 0x102   :  { %1306 = vmatpush3.msra.mxu0 %v1662_v12 }
 0x103   :  { %1307 = vmatprep.subr.mxu0 %v1558_v2 }
 0x104   :  { %1308 = vmatpush3.msra.mxu0 %v1672_v14 }
 0x105   :  { %1309 = vmatprep.subr.mxu0 %v1558_v2 }
 0x106   :  { %1310 = vmatpush3.msra.mxu0 %v1682_v16  ;;  %v1902_v49 = vpop.f32.mrf.mxu0 }
 0x107   :  { %1311 = vmatprep.subr.mxu0 %v1558_v2  ;;  %v142_v1 = vadd.f32 %v1902_v49, %v1865_v43  ;;  %v856_v49 = vld [vmem:[%s2204_s6 + $0x28] sm:$0xff] }
 0x108   :  { %1312 = vmatpush3.msra.mxu0 %v1692_v18  ;;  %v136_v50 = vpop.f32.mrf.mxu0 }
 0x109   :  { %1313 = vmatprep.subr.mxu0 %v1558_v2  ;;  %v137_v60 = vadd.f32 %v1865_v43, %v136_v50  ;;  %v855_v50 = vld [vmem:[%s2204_s6 + $0x20] sm:$0xff] }
 0x10a   :  { %1314 = vmatpush3.msra.mxu0 %v1702_v20  ;;  %v1904_v51 = vpop.f32.mrf.mxu0 }
 0x10b   :  { %1315 = vmatprep.subr.mxu0 %v1558_v2 }
 0x10c   :  { %1316 = vmatpush3.msra.mxu0 %v1712_v22  ;;  %v1906_v52 = vpop.f32.mrf.mxu0 }
 0x10d   :  { %1317 = vmatprep.subr.mxu0 %v1558_v2  ;;  %v147_v13 = vadd.f32 %v1865_v43, %v1906_v52 }
 0x10e   :  { %1318 = vmatpush3.msra.mxu0 %v1722_v24  ;;  %v1908_v53 = vpop.f32.mrf.mxu0 }
 0x10f   :  { %1319 = vmatprep.subr.mxu0 %v1558_v2  ;;  %v162_v52 = vadd.f32 %v1908_v53, %v1865_v43  ;;  %v950_v53 = vld [vmem:[%s2205_s5] ss:$0 sm:$0xff] }
 0x110   :  { %1320 = vmatpush3.msra.mxu0 %v1732_v26  ;;  %v1910_v54 = vpop.f32.mrf.mxu0 }
 0x111   :  { %1321 = vmatprep.subr.mxu0 %v1558_v2 }
 0x112   :  { %1322 = vmatpush3.msra.mxu0 %v1742_v28 }
 0x113   :  { %1323 = vmatprep.subr.mxu0 %v1558_v2 }
 0x114   :  { %1324 = vmatpush3.msra.mxu0 %v1756_v31 }
 0x115   :  { %1325 = vmatprep.subr.mxu0 %v1558_v2 }
 0x116   :  { %1326 = vmatpush3.msra.mxu0 %v1765_v33 }
 0x117   :  { %1365 = vmatprep.subr.mxu0 %v1558_v2 }
 0x1b7   :  { %v319_v56 = vpop.f32.mrf.mxu0 }
 0x1b8   :  { %v323_v57 = vadd.f32 %v319_v56, %v132_v55 }
 0x1b9   :  { %v1259_v58 = vpop.f32.mrf.mxu0 }
 0x1ba   :  { %1544 = vtanh.f32 %v323_v57  ;;  %v853_v58 = vld [vmem:[%s2204_s6 + $0x10] sm:$0xff] }
 0x1c7   :  { %v1545_v59 = vpop.eup %1544 }
 0x1c8   :  { %1293 = vmatmul.mubr.f32.vlgmr.msra.gmra.mxu1 %v1545_v59  ;;  %v852_v59 = vld [vmem:[%s2204_s6 + $0x8] sm:$0xff] }
 0x1c9   :  { %1331 = vmatpush3.msra.mxu1 %v1615_v3  ;;  %1362 = vmatprep.mubr.msk.f32.mxu1 %vm1559_vm0, %v1558_v2 }
 0x1ca   :  { %1332 = vmatprep.subr.mxu1 %v1558_v2 }
 0x1cb   :  { %1333 = vmatpush3.msra.mxu1 %v1623_v4 }
 0x1cc   :  { %1334 = vmatprep.subr.mxu1 %v1558_v2 }
 0x1cd   :  { %1335 = vmatpush3.msra.mxu1 %v1632_v6 }
 0x1ce   :  { %1336 = vmatprep.subr.mxu1 %v1558_v2 }
 0x1cf   :  { %1337 = vmatpush3.msra.mxu1 %v1642_v8 }
 0x1d0   :  { %1338 = vmatprep.subr.mxu1 %v1558_v2 }
 0x1d1   :  { %1339 = vmatpush3.msra.mxu1 %v1652_v10 }
 0x1d2   :  { %1340 = vmatprep.subr.mxu1 %v1558_v2 }
 0x1d3   :  { %1341 = vmatpush3.msra.mxu1 %v1662_v12 }
 0x1d4   :  { %1342 = vmatprep.subr.mxu1 %v1558_v2 }
 0x1d5   :  { %1343 = vmatpush3.msra.mxu1 %v1672_v14 }
 0x1d6   :  { %1344 = vmatprep.subr.mxu1 %v1558_v2 }
 0x1d7   :  { %1345 = vmatpush3.msra.mxu1 %v1682_v16 }
 0x1d8   :  { %1346 = vmatprep.subr.mxu1 %v1558_v2 }
 0x1d9   :  { %1347 = vmatpush3.msra.mxu1 %v1692_v18 }
 0x1da   :  { %1348 = vmatprep.subr.mxu1 %v1558_v2 }
 0x1db   :  { %1349 = vmatpush3.msra.mxu1 %v1702_v20 }
 0x1dc   :  { %1350 = vmatprep.subr.mxu1 %v1558_v2 }
 0x1dd   :  { %1351 = vmatpush3.msra.mxu1 %v1712_v22 }
 0x1de   :  { %1352 = vmatprep.subr.mxu1 %v1558_v2 }
 0x1df   :  { %1353 = vmatpush3.msra.mxu1 %v1722_v24 }
 0x1e0   :  { %1354 = vmatprep.subr.mxu1 %v1558_v2 }
 0x1e1   :  { %1355 = vmatpush3.msra.mxu1 %v1732_v26 }
 0x1e2   :  { %1356 = vmatprep.subr.mxu1 %v1558_v2 }
 0x1e3   :  { %1357 = vmatpush3.msra.mxu1 %v1742_v28 }
 0x1e4   :  { %1358 = vmatprep.subr.mxu1 %v1558_v2 }
 0x1e5   :  { %1359 = vmatpush3.msra.mxu1 %v1756_v31 }
 0x1e6   :  { %1360 = vmatprep.subr.mxu1 %v1558_v2 }
 0x1e7   :  { %1361 = vmatpush3.msra.mxu1 %v1765_v33 }
 0x1e8   :  { %1400 = vmatprep.subr.mxu1 %v1558_v2 }
 0x288   :  { %v391_v61 = vpop.f32.mrf.mxu1 }
 0x289   :  { %v395_v62 = vadd.f32 %v391_v61, %v137_v60 }
 0x28a   :  { %v1294_v63 = vpop.f32.mrf.mxu1 }
 0x28b   :  { %1546 = vtanh.f32 %v395_v62 }
 0x298   :  { %v1547_v0 = vpop.eup %1546 }
 0x299   :  { %1328 = vmatmul.mubr.f32.vlgmr.msra.gmra.mxu0 %v1547_v0  ;;  %v951_v0 = vld [vmem:[%s2206_s7] ss:$0 sm:$0xff] }
 0x29a   :  { %1366 = vmatpush3.msra.mxu0 %v1615_v3  ;;  %1397 = vmatprep.mubr.msk.f32.mxu0 %vm1559_vm0, %v1558_v2 }
 0x29b   :  { %1367 = vmatprep.subr.mxu0 %v1558_v2 }
 0x29c   :  { %1368 = vmatpush3.msra.mxu0 %v1623_v4 }
 0x29d   :  { %1369 = vmatprep.subr.mxu0 %v1558_v2 }
 0x29e   :  { %1370 = vmatpush3.msra.mxu0 %v1632_v6 }
 0x29f   :  { %1371 = vmatprep.subr.mxu0 %v1558_v2 }
 0x2a0   :  { %1372 = vmatpush3.msra.mxu0 %v1642_v8 }
 0x2a1   :  { %1373 = vmatprep.subr.mxu0 %v1558_v2 }
 0x2a2   :  { %1374 = vmatpush3.msra.mxu0 %v1652_v10 }
 0x2a3   :  { %1375 = vmatprep.subr.mxu0 %v1558_v2 }
 0x2a4   :  { %1376 = vmatpush3.msra.mxu0 %v1662_v12 }
 0x2a5   :  { %1377 = vmatprep.subr.mxu0 %v1558_v2 }
 0x2a6   :  { %1378 = vmatpush3.msra.mxu0 %v1672_v14 }
 0x2a7   :  { %1379 = vmatprep.subr.mxu0 %v1558_v2 }
 0x2a8   :  { %1380 = vmatpush3.msra.mxu0 %v1682_v16 }
 0x2a9   :  { %1381 = vmatprep.subr.mxu0 %v1558_v2 }
 0x2aa   :  { %1382 = vmatpush3.msra.mxu0 %v1692_v18 }
 0x2ab   :  { %1383 = vmatprep.subr.mxu0 %v1558_v2 }
 0x2ac   :  { %1384 = vmatpush3.msra.mxu0 %v1702_v20 }
 0x2ad   :  { %1385 = vmatprep.subr.mxu0 %v1558_v2 }
 0x2ae   :  { %1386 = vmatpush3.msra.mxu0 %v1712_v22 }
 0x2af   :  { %1387 = vmatprep.subr.mxu0 %v1558_v2 }
 0x2b0   :  { %1388 = vmatpush3.msra.mxu0 %v1722_v24 }
 0x2b1   :  { %1389 = vmatprep.subr.mxu0 %v1558_v2 }
 0x2b2   :  { %1390 = vmatpush3.msra.mxu0 %v1732_v26 }
 0x2b3   :  { %1391 = vmatprep.subr.mxu0 %v1558_v2 }
 0x2b4   :  { %1392 = vmatpush3.msra.mxu0 %v1742_v28 }
 0x2b5   :  { %1393 = vmatprep.subr.mxu0 %v1558_v2 }
 0x2b6   :  { %1394 = vmatpush3.msra.mxu0 %v1756_v31 }
 0x2b7   :  { %1395 = vmatprep.subr.mxu0 %v1558_v2 }
 0x2b8   :  { %1396 = vmatpush3.msra.mxu0 %v1765_v33 }
 0x2b9   :  { %1435 = vmatprep.subr.mxu0 %v1558_v2 }
 0x359   :  { %v463_v5 = vpop.f32.mrf.mxu0 }
 0x35a   :  { %v467_v7 = vadd.f32 %v463_v5, %v142_v1 }
 0x35b   :  { %v1329_v9 = vpop.f32.mrf.mxu0 }
 0x35c   :  { %1548 = vtanh.f32 %v467_v7 }
 0x369   :  { %v1549_v11 = vpop.eup %1548 }
 0x36a   :  { %1363 = vmatmul.mubr.f32.vlgmr.msra.gmra.mxu1 %v1549_v11 }
 0x36b   :  { %1401 = vmatpush3.msra.mxu1 %v1615_v3  ;;  %1432 = vmatprep.mubr.msk.f32.mxu1 %vm1559_vm0, %v1558_v2 }
 0x36c   :  { %1402 = vmatprep.subr.mxu1 %v1558_v2 }
 0x36d   :  { %1403 = vmatpush3.msra.mxu1 %v1623_v4 }
 0x36e   :  { %1404 = vmatprep.subr.mxu1 %v1558_v2 }
 0x36f   :  { %1405 = vmatpush3.msra.mxu1 %v1632_v6 }
 0x370   :  { %1406 = vmatprep.subr.mxu1 %v1558_v2 }
 0x371   :  { %1407 = vmatpush3.msra.mxu1 %v1642_v8 }
 0x372   :  { %1408 = vmatprep.subr.mxu1 %v1558_v2 }
 0x373   :  { %1409 = vmatpush3.msra.mxu1 %v1652_v10 }
 0x374   :  { %1410 = vmatprep.subr.mxu1 %v1558_v2 }
 0x375   :  { %1411 = vmatpush3.msra.mxu1 %v1662_v12 }
 0x376   :  { %1412 = vmatprep.subr.mxu1 %v1558_v2 }
 0x377   :  { %1413 = vmatpush3.msra.mxu1 %v1672_v14 }
 0x378   :  { %1414 = vmatprep.subr.mxu1 %v1558_v2 }
 0x379   :  { %1415 = vmatpush3.msra.mxu1 %v1682_v16 }
 0x37a   :  { %1416 = vmatprep.subr.mxu1 %v1558_v2 }
 0x37b   :  { %1417 = vmatpush3.msra.mxu1 %v1692_v18 }
 0x37c   :  { %1418 = vmatprep.subr.mxu1 %v1558_v2 }
 0x37d   :  { %1419 = vmatpush3.msra.mxu1 %v1702_v20 }
 0x37e   :  { %1420 = vmatprep.subr.mxu1 %v1558_v2 }
 0x37f   :  { %1421 = vmatpush3.msra.mxu1 %v1712_v22 }
 0x380   :  { %1422 = vmatprep.subr.mxu1 %v1558_v2 }
 0x381   :  { %1423 = vmatpush3.msra.mxu1 %v1722_v24 }
 0x382   :  { %1424 = vmatprep.subr.mxu1 %v1558_v2 }
 0x383   :  { %1425 = vmatpush3.msra.mxu1 %v1732_v26 }
 0x384   :  { %1426 = vmatprep.subr.mxu1 %v1558_v2 }
 0x385   :  { %1427 = vmatpush3.msra.mxu1 %v1742_v28 }
 0x386   :  { %1428 = vmatprep.subr.mxu1 %v1558_v2 }
 0x387   :  { %1429 = vmatpush3.msra.mxu1 %v1756_v31 }
 0x388   :  { %1430 = vmatprep.subr.mxu1 %v1558_v2 }
 0x389   :  { %1431 = vmatpush3.msra.mxu1 %v1765_v33 }
 0x38a   :  { %1470 = vmatprep.subr.mxu1 %v1558_v2 }
 0x42a   :  { %v535_v15 = vpop.f32.mrf.mxu1 }
 0x42b   :  { %v539_v17 = vadd.f32 %v535_v15, %v147_v13 }
 0x42c   :  { %v1364_v19 = vpop.f32.mrf.mxu1 }
 0x42d   :  { %1550 = vtanh.f32 %v539_v17 }
 0x43a   :  { %v1551_v21 = vpop.eup %1550 }
 0x43b   :  { %1398 = vmatmul.mubr.f32.vlgmr.msra.gmra.mxu0 %v1551_v21 }
 0x43c   :  { %1436 = vmatpush3.msra.mxu0 %v1615_v3  ;;  %1467 = vmatprep.mubr.msk.f32.mxu0 %vm1559_vm0, %v1558_v2  ;;  %v152_v3 = vadd.f32 %v1904_v51, %v1865_v43  ;;  %v854_v51 = vld [vmem:[%s2204_s6 + $0x18] sm:$0xff] }
 0x43d   :  { %1437 = vmatprep.subr.mxu0 %v1558_v2 }
 0x43e   :  { %1438 = vmatpush3.msra.mxu0 %v1623_v4 }
 0x43f   :  { %1439 = vmatprep.subr.mxu0 %v1558_v2 }
 0x440   :  { %1440 = vmatpush3.msra.mxu0 %v1632_v6 }
 0x441   :  { %1441 = vmatprep.subr.mxu0 %v1558_v2 }
 0x442   :  { %1442 = vmatpush3.msra.mxu0 %v1642_v8 }
 0x443   :  { %1443 = vmatprep.subr.mxu0 %v1558_v2 }
 0x444   :  { %1444 = vmatpush3.msra.mxu0 %v1652_v10 }
 0x445   :  { %1445 = vmatprep.subr.mxu0 %v1558_v2 }
 0x446   :  { %1446 = vmatpush3.msra.mxu0 %v1662_v12  ;;  %v772_v12 = vld [vmem:[%s2203_s4 + $0x78] sm:$0xff] }
 0x447   :  { %1447 = vmatprep.subr.mxu0 %v1558_v2 }
 0x448   :  { %1448 = vmatpush3.msra.mxu0 %v1672_v14  ;;  %v771_v14 = vld [vmem:[%s2203_s4 + $0x70] sm:$0xff] }
 0x449   :  { %1449 = vmatprep.subr.mxu0 %v1558_v2 }
 0x44a   :  { %1450 = vmatpush3.msra.mxu0 %v1682_v16  ;;  %v770_v16 = vld [vmem:[%s2203_s4 + $0x68] sm:$0xff] }
 0x44b   :  { %1451 = vmatprep.subr.mxu0 %v1558_v2 }
 0x44c   :  { %1452 = vmatpush3.msra.mxu0 %v1692_v18  ;;  %v769_v18 = vld [vmem:[%s2203_s4 + $0x60] sm:$0xff] }
 0x44d   :  { %1453 = vmatprep.subr.mxu0 %v1558_v2 }
 0x44e   :  { %1454 = vmatpush3.msra.mxu0 %v1702_v20  ;;  %v768_v20 = vld [vmem:[%s2203_s4 + $0x58] sm:$0xff] }
 0x44f   :  { %1455 = vmatprep.subr.mxu0 %v1558_v2 }
 0x450   :  { %1456 = vmatpush3.msra.mxu0 %v1712_v22  ;;  %v767_v22 = vld [vmem:[%s2203_s4 + $0x50] sm:$0xff] }
 0x451   :  { %1457 = vmatprep.subr.mxu0 %v1558_v2 }
 0x452   :  { %1458 = vmatpush3.msra.mxu0 %v1722_v24  ;;  %v157_v24 = vadd.f32 %v1865_v43, %v1910_v54  ;;  %v851_v43 = vld [vmem:[%s2204_s6] sm:$0xff] }
 0x453   :  { %1459 = vmatprep.subr.mxu0 %v1558_v2 }
 0x454   :  { %1460 = vmatpush3.msra.mxu0 %v1732_v26 }
 0x455   :  { %1461 = vmatprep.subr.mxu0 %v1558_v2 }
 0x456   :  { %1462 = vmatpush3.msra.mxu0 %v1742_v28 }
 0x457   :  { %1463 = vmatprep.subr.mxu0 %v1558_v2 }
 0x458   :  { %1464 = vmatpush3.msra.mxu0 %v1756_v31  ;;  %v763_v31 = vld [vmem:[%s2203_s4 + $0x30] sm:$0xff] }
 0x459   :  { %1465 = vmatprep.subr.mxu0 %v1558_v2 }
 0x45a   :  { %1466 = vmatpush3.msra.mxu0 %v1765_v33  ;;  %v761_v33 = vld [vmem:[%s2203_s4 + $0x20] sm:$0xff] }
 0x45b   :  { %1505 = vmatprep.subr.mxu0 %v1558_v2 }
 0x4fb   :  { %v607_v4 = vpop.f32.mrf.mxu0 }
 0x4fc   :  { %v611_v6 = vadd.f32 %v607_v4, %v152_v3 }
 0x4fd   :  { %v1399_v8 = vpop.f32.mrf.mxu0 }
 0x4fe   :  { %1552 = vtanh.f32 %v611_v6 }
 0x50b   :  { %v1553_v10 = vpop.eup %1552 }
 0x50c   :  { %1433 = vmatmul.mubr.f32.vlgmr.msra.gmra.mxu1 %v1553_v10 }
 0x50d   :  { %1502 = vmatprep.mubr.msk.f32.mxu1 %vm1559_vm0, %v1558_v2  ;;  %1471 = vmatpush3.msra.mxu1 %v772_v12 }
 0x50e   :  { %1472 = vmatprep.subr.mxu1 %v1558_v2 }
 0x50f   :  { %1473 = vmatpush3.msra.mxu1 %v771_v14 }
 0x510   :  { %1474 = vmatprep.subr.mxu1 %v1558_v2 }
 0x511   :  { %1475 = vmatpush3.msra.mxu1 %v770_v16 }
 0x512   :  { %1476 = vmatprep.subr.mxu1 %v1558_v2 }
 0x513   :  { %1477 = vmatpush3.msra.mxu1 %v769_v18 }
 0x514   :  { %1478 = vmatprep.subr.mxu1 %v1558_v2 }
 0x515   :  { %1479 = vmatpush3.msra.mxu1 %v768_v20 }
 0x516   :  { %1480 = vmatprep.subr.mxu1 %v1558_v2 }
 0x517   :  { %1481 = vmatpush3.msra.mxu1 %v767_v22 }
 0x518   :  { %1482 = vmatprep.subr.mxu1 %v1558_v2 }
 0x519   :  { %1483 = vmatpush3.msra.mxu1 %v766_v23 }
 0x51a   :  { %1484 = vmatprep.subr.mxu1 %v1558_v2 }
 0x51b   :  { %1485 = vmatpush3.msra.mxu1 %v765_v29 }
 0x51c   :  { %1486 = vmatprep.subr.mxu1 %v1558_v2 }
 0x51d   :  { %1487 = vmatpush3.msra.mxu1 %v764_v30 }
 0x51e   :  { %1488 = vmatprep.subr.mxu1 %v1558_v2 }
 0x51f   :  { %1489 = vmatpush3.msra.mxu1 %v763_v31 }
 0x520   :  { %1490 = vmatprep.subr.mxu1 %v1558_v2 }
 0x521   :  { %1491 = vmatpush3.msra.mxu1 %v762_v32 }
 0x522   :  { %1492 = vmatprep.subr.mxu1 %v1558_v2 }
 0x523   :  { %1493 = vmatpush3.msra.mxu1 %v761_v33 }
 0x524   :  { %1494 = vmatprep.subr.mxu1 %v1558_v2 }
 0x525   :  { %1495 = vmatpush3.msra.mxu1 %v760_v34 }
 0x526   :  { %1496 = vmatprep.subr.mxu1 %v1558_v2 }
 0x527   :  { %1497 = vmatpush3.msra.mxu1 %v759_v35 }
 0x528   :  { %1498 = vmatprep.subr.mxu1 %v1558_v2 }
 0x529   :  { %1499 = vmatpush3.msra.mxu1 %v758_v36 }
 0x52a   :  { %1500 = vmatprep.subr.mxu1 %v1558_v2 }
 0x52b   :  { %1501 = vmatpush3.msra.mxu1 %v757_v37 }
 0x5cc   :  { %v679_v25 = vpop.f32.mrf.mxu1 }
 0x5cd   :  { %v683_v26 = vadd.f32 %v679_v25, %v157_v24 }
 0x5ce   :  { %v1434_v27 = vpop.f32.mrf.mxu1 }
 0x5cf   :  { %1554 = vtanh.f32 %v683_v26 }
 0x5dc   :  { %v1555_v28 = vpop.eup %1554 }
 0x5dd   :  { %1468 = vmatmul.mubr.f32.vlgmr.msra.gmra.mxu0 %v1555_v28 }
 0x5de   :  { %1537 = vmatprep.mubr.msk.f32.mxu0 %vm1559_vm0, %v1558_v2  ;;  %1506 = vmatpush3.msra.mxu0 %v866_v38 }
 0x5df   :  { %1507 = vmatprep.subr.mxu0 %v1558_v2 }
 0x5e0   :  { %1508 = vmatpush3.msra.mxu0 %v865_v39 }
 0x5e1   :  { %1509 = vmatprep.subr.mxu0 %v1558_v2 }
 0x5e2   :  { %1510 = vmatpush3.msra.mxu0 %v864_v40 }
 0x5e3   :  { %1511 = vmatprep.subr.mxu0 %v1558_v2 }
 0x5e4   :  { %1512 = vmatpush3.msra.mxu0 %v863_v41 }
 0x5e5   :  { %1513 = vmatprep.subr.mxu0 %v1558_v2 }
 0x5e6   :  { %1514 = vmatpush3.msra.mxu0 %v862_v42 }
 0x5e7   :  { %1515 = vmatprep.subr.mxu0 %v1558_v2 }
 0x5e8   :  { %1516 = vmatpush3.msra.mxu0 %v861_v44 }
 0x5e9   :  { %1517 = vmatprep.subr.mxu0 %v1558_v2 }
 0x5ea   :  { %1518 = vmatpush3.msra.mxu0 %v860_v45 }
 0x5eb   :  { %1519 = vmatprep.subr.mxu0 %v1558_v2 }
 0x5ec   :  { %1520 = vmatpush3.msra.mxu0 %v859_v46 }
 0x5ed   :  { %1521 = vmatprep.subr.mxu0 %v1558_v2 }
 0x5ee   :  { %1522 = vmatpush3.msra.mxu0 %v858_v47 }
 0x5ef   :  { %1523 = vmatprep.subr.mxu0 %v1558_v2 }
 0x5f0   :  { %1524 = vmatpush3.msra.mxu0 %v857_v48 }
 0x5f1   :  { %1525 = vmatprep.subr.mxu0 %v1558_v2 }
 0x5f2   :  { %1526 = vmatpush3.msra.mxu0 %v856_v49 }
 0x5f3   :  { %1527 = vmatprep.subr.mxu0 %v1558_v2 }
 0x5f4   :  { %1528 = vmatpush3.msra.mxu0 %v855_v50 }
 0x5f5   :  { %1529 = vmatprep.subr.mxu0 %v1558_v2 }
 0x5f6   :  { %1530 = vmatpush3.msra.mxu0 %v854_v51 }
 0x5f7   :  { %1531 = vmatprep.subr.mxu0 %v1558_v2 }
 0x5f8   :  { %1532 = vmatpush3.msra.mxu0 %v853_v58 }
 0x5f9   :  { %1533 = vmatprep.subr.mxu0 %v1558_v2 }
 0x5fa   :  { %1534 = vmatpush3.msra.mxu0 %v852_v59 }
 0x5fb   :  { %1535 = vmatprep.subr.mxu0 %v1558_v2 }
 0x5fc   :  { %1536 = vmatpush3.msra.mxu0 %v851_v43 }
 0x69d   :  { %v751_v54 = vpop.f32.mrf.mxu0 }
 0x69e   :  { %v755_v55 = vadd.f32 %v751_v54, %v162_v52 }
 0x69f   :  { %v1469_v56 = vpop.f32.mrf.mxu0 }
 0x6a0   :  { %1556 = vtanh.f32 %v755_v55 }
 0x6ad   :  { %v1557_v57 = vpop.eup %1556 }
 0x6ae   :  { %1503 = vmatmul.mubr.f32.vlgmr.msra.gmra.mxu1 %v1557_v57 }
 0x76e   :  { %v846_v60 = vpop.f32.mrf.mxu1 }
 0x76f   :  { %v847_v61 = vadd.f32 %v950_v53, %v846_v60 }
 0x770   :  { %v1504_v62 = vpop.f32.mrf.mxu1 }
 0x771   :  { %v850_v63 = vmax.f32 %v847_v61, 0.0 }
 0x773   :  { %1538 = vmatmul.mubr.f32.vlgmr.msra.gmra.mxu0 %v850_v63 }
 0x833   :  { %v940_v1 = vpop.f32.mrf.mxu0 }
 0x834   :  { %v941_v2 = vadd.f32 %v951_v0, %v940_v1 }
 0x835   :  { %v1539_v5 = vpop.f32.mrf.mxu0 }
 0x836   :  { %944 = vst [vmem:[%s2207_s8] sm:$0xff] %v941_v2 }

</bundles_post_ra>
